<compile_context>
chip_gen: v6e
topology: v6e:2x2x1
jax: 0.10.0
libtpu: 0.0.40
codegen_flags: <defaults>
</compile_context>

<pallas_src>
import functools

import jax
import jax.numpy as jnp
from jax.experimental import pallas as pl
from jax.experimental.pallas import tpu as pltpu

_LANE = 128
_SUBLANE = 8


def _round_up(n, m):
    return ((n + m - 1) // m) * m


def _apply_activation(h, name):
    if name == "relu":
        return jnp.maximum(h, 0.0)
    elif name == "sigmoid":
        return jax.nn.sigmoid(h)
    elif name == "tanh":
        return jnp.tanh(h)
    else:
        raise ValueError(f"Unsupported activation: {name}")


def _encoder_kernel(*refs, activations, compute_dtype):
    # refs = (x_ref, w1, b1, w2, b2, ..., wL, bL, out_ref)
    x_ref = refs[0]
    out_ref = refs[-1]
    param_refs = refs[1:-1]
    n_layers = len(param_refs) // 2

    # Bias add / activations stay in f32 (VPU/EUP); only MXU operands are cast
    # to bf16 (compute_dtype) with f32 accumulation.
    h = x_ref[...].astype(jnp.float32)
    for i in range(n_layers):
        w_ref = param_refs[2 * i]
        b_ref = param_refs[2 * i + 1]
        h = (
            jnp.dot(
                h.astype(compute_dtype),
                w_ref[...],
                preferred_element_type=jnp.float32,
            )
            + b_ref[...]
        )
        if i < n_layers - 1:
            # hidden block: Linear -> activation (-> Dropout, identity in eval)
            h = _apply_activation(h, activations[i])
        # final layer: plain Linear to latent space (no activation)
    out_ref[...] = h.astype(out_ref.dtype)


def encoder_forward(x, params, activations, *, block_m=128,
                    compute_dtype=jnp.bfloat16):
    """Fused MLP encoder forward pass (eval mode).

    x:      (batch, input_dim) f32
    params: list of (W, b) with W shaped (in, out), b shaped (out,)
    """
    batch, feat = x.shape
    latent_dim = params[-1][0].shape[1]
    n_layers = len(params)

    # ---- Pad all feature dims up to multiples of 128 lanes.
    x_p = x
    feat_p = _round_up(feat, _LANE)
    if feat_p != feat:
        x_p = jnp.pad(x_p, ((0, 0), (0, feat_p - feat)))

    prepared = []
    cur_in, cur_in_p = feat, feat_p
    for w, b in params:
        in_dim, out_dim = w.shape
        assert in_dim == cur_in, "layer dims must chain"
        out_p = _round_up(out_dim, _LANE)
        w_pad = jnp.pad(w, ((0, cur_in_p - in_dim), (0, out_p - out_dim)))
        b_pad = jnp.pad(jnp.reshape(b, (1, -1)), ((0, 0), (0, out_p - out_dim)))
        prepared.append((w_pad.astype(compute_dtype), b_pad.astype(jnp.float32)))
        cur_in, cur_in_p = out_dim, out_p
    latent_p = cur_in_p

    # ---- Batch tiling: grid over batch rows; weights stay resident in VMEM.
    tm = max(_SUBLANE,
             min(_round_up(block_m, _SUBLANE), _round_up(batch, _SUBLANE)))
    batch_p = _round_up(batch, tm)
    if batch_p != batch:
        x_p = jnp.pad(x_p, ((0, batch_p - batch), (0, 0)))
    grid_m = batch_p // tm

    flat_params = []
    for w, b in prepared:
        flat_params.extend([w, b])

    in_specs = [pl.BlockSpec((tm, feat_p), lambda i: (i, 0))]
    for a in flat_params:
        # Full-array block, constant index map -> loaded once, reused every step.
        in_specs.append(pl.BlockSpec(a.shape, lambda i: (0, 0)))
    out_spec = pl.BlockSpec((tm, latent_p), lambda i: (i, 0))
    out_shape = jax.ShapeDtypeStruct((batch_p, latent_p), jnp.float32)

    # ---- Cost estimate (helps XLA schedule HBM traffic around the call).
    flops = 0
    transcendentals = 0
    for li, (w, _) in enumerate(prepared):
        k, n = w.shape
        flops += 2 * batch_p * k * n
        if li < n_layers - 1 and activations[li] in ("tanh", "sigmoid"):
            transcendentals += batch_p * n
    bytes_accessed = int(
        x_p.size * x_p.dtype.itemsize
        + sum(a.size * a.dtype.itemsize for a in flat_params)
        + batch_p * latent_p * 4
    )

    kernel = functools.partial(
        _encoder_kernel,
        activations=tuple(activations),
        compute_dtype=compute_dtype,
    )

    out = pl.pallas_call(
        kernel,
        out_shape=out_shape,
        grid=(grid_m,),
        in_specs=in_specs,
        out_specs=out_spec,
        compiler_params=pltpu.CompilerParams(
            dimension_semantics=("parallel",),
        ),
        cost_estimate=pl.CostEstimate(
            flops=flops,
            transcendentals=transcendentals,
            bytes_accessed=bytes_accessed,
        ),
    )(x_p, *flat_params)

    return out[:batch, :latent_dim]


def init_linear_params(key, in_dim, out_dim):
    """Match PyTorch nn.Linear default init: U(-1/sqrt(in), 1/sqrt(in))."""
    kw, kb = jax.random.split(key)
    bound = 1.0 / jnp.sqrt(jnp.float32(in_dim))
    w = jax.random.uniform(kw, (in_dim, out_dim), jnp.float32, -bound, bound)
    b = jax.random.uniform(kb, (out_dim,), jnp.float32, -bound, bound)
    return w, b


def encoder_reference_bf16(x, params, activations, compute_dtype=jnp.bfloat16):
    """Pure-JAX reference matching the kernel math (bf16 matmul, f32 accumulate)."""
    h = x.astype(jnp.float32)
    n_layers = len(params)
    for i, (w, b) in enumerate(params):
        h = jnp.dot(h.astype(compute_dtype), w.astype(compute_dtype),
                    preferred_element_type=jnp.float32) + jnp.reshape(b, (1, -1))
        if i < n_layers - 1:
            h = _apply_activation(h, activations[i])
    return h


def encoder_reference_f32(x, params, activations):
    h = x
    n_layers = len(params)
    for i, (w, b) in enumerate(params):
        h = h @ w + jnp.reshape(b, (1, -1))
        if i < n_layers - 1:
            h = _apply_activation(h, activations[i])
    return h


if __name__ == "__main__":
    # Small shapes consistent with the module: 2 hidden blocks + latent head.
    batch = 64
    input_dim = 256
    hidden_dims = [256, 128]
    latent_dim = 100                 # deliberately not a multiple of 128
    activations = ["relu", "tanh"]   # exercises VPU and EUP activation kinds

    key = jax.random.PRNGKey(0)
    kx, k1, k2, k3 = jax.random.split(key, 4)

    x = jax.random.normal(kx, (batch, input_dim), jnp.float32)

    dims = [input_dim] + hidden_dims + [latent_dim]
    layer_keys = [k1, k2, k3]
    params = [
        init_linear_params(layer_keys[i], dims[i], dims[i + 1])
        for i in range(len(dims) - 1)
    ]

    # block_m=16 -> grid=(4,) so the batch pipeline actually exercises >1 step.
    out = encoder_forward(x, params, activations, block_m=16)
    out = jax.block_until_ready(out)

    assert out.shape == (batch, latent_dim)

    ref_bf16 = encoder_reference_bf16(x, params, activations)
    ref_f32 = encoder_reference_f32(x, params, activations)
    assert jnp.allclose(out, ref_bf16, atol=1e-2, rtol=1e-2), \
        "mismatch vs bf16-matmul reference"
    assert jnp.allclose(out, ref_f32, atol=1e-1, rtol=1e-1), \
        "mismatch vs f32 reference"

    print("KERNEL_OK")
</pallas_src>

<mosaic_0001>
module attributes {stable_mosaic.version = 11 : i64} {
  func.func @_encoder_kernel(%arg0: i32, %arg1: memref<16x256xf32, #tpu.memory_space<vmem>>, %arg2: memref<256x256xbf16, #tpu.memory_space<vmem>>, %arg3: memref<1x256xf32, #tpu.memory_space<vmem>>, %arg4: memref<256x128xbf16, #tpu.memory_space<vmem>>, %arg5: memref<1x128xf32, #tpu.memory_space<vmem>>, %arg6: memref<128x128xbf16, #tpu.memory_space<vmem>>, %arg7: memref<1x128xf32, #tpu.memory_space<vmem>>, %arg8: memref<16x128xf32, #tpu.memory_space<vmem>>) attributes {dimension_semantics = [#tpu.dimension_semantics<parallel>], iteration_bounds = array<i64: 4>, scalar_prefetch = 0 : i64, scratch_operands = 0 : i64, tpu.core_type = #tpu.core_type<tc>, window_params = [{transform_indices = @transform_0, window_bounds = array<i64: 16, 256>}, {pipeline_mode = #tpu.pipeline_mode<synchronous>, transform_indices = @transform_1, window_bounds = array<i64: 256, 256>}, {pipeline_mode = #tpu.pipeline_mode<synchronous>, transform_indices = @transform_2, window_bounds = array<i64: 1, 256>}, {pipeline_mode = #tpu.pipeline_mode<synchronous>, transform_indices = @transform_3, window_bounds = array<i64: 256, 128>}, {pipeline_mode = #tpu.pipeline_mode<synchronous>, transform_indices = @transform_4, window_bounds = array<i64: 1, 128>}, {pipeline_mode = #tpu.pipeline_mode<synchronous>, transform_indices = @transform_5, window_bounds = array<i64: 128, 128>}, {pipeline_mode = #tpu.pipeline_mode<synchronous>, transform_indices = @transform_6, window_bounds = array<i64: 1, 128>}, {transform_indices = @transform_7, window_bounds = array<i64: 16, 128>}]} {
    %c0 = arith.constant 0 : index
    %c0_0 = arith.constant 0 : index
    %0 = vector.load %arg1[%c0, %c0_0] : memref<16x256xf32, #tpu.memory_space<vmem>>, vector<16x256xf32>
    %1 = arith.truncf %0 : vector<16x256xf32> to vector<16x256xbf16>
    %c0_1 = arith.constant 0 : index
    %c0_2 = arith.constant 0 : index
    %2 = vector.load %arg2[%c0_1, %c0_2] : memref<256x256xbf16, #tpu.memory_space<vmem>>, vector<256x256xbf16>
    %cst = arith.constant dense<0.000000e+00> : vector<16x256xf32>
    %3 = tpu.matmul %1, %2, %cst {dimension_numbers = #tpu.dot_dimension_numbers<[1], [0], [0], [1], [0, 0, 1, 1], [], []>} : vector<16x256xbf16>, vector<256x256xbf16>, vector<16x256xf32> -> vector<16x256xf32>
    %c0_3 = arith.constant 0 : index
    %c0_4 = arith.constant 0 : index
    %4 = vector.load %arg3[%c0_3, %c0_4] : memref<1x256xf32, #tpu.memory_space<vmem>>, vector<1x256xf32>
    %5 = vector.broadcast %4 : vector<1x256xf32> to vector<16x256xf32>
    %6 = arith.addf %3, %5 : vector<16x256xf32>
    %cst_5 = arith.constant 0.000000e+00 : f32
    %7 = vector.broadcast %cst_5 : f32 to vector<16x256xf32>
    %8 = arith.maximumf %6, %7 : vector<16x256xf32>
    %9 = arith.truncf %8 : vector<16x256xf32> to vector<16x256xbf16>
    %c0_6 = arith.constant 0 : index
    %c0_7 = arith.constant 0 : index
    %10 = vector.load %arg4[%c0_6, %c0_7] : memref<256x128xbf16, #tpu.memory_space<vmem>>, vector<256x128xbf16>
    %cst_8 = arith.constant dense<0.000000e+00> : vector<16x128xf32>
    %11 = tpu.matmul %9, %10, %cst_8 {dimension_numbers = #tpu.dot_dimension_numbers<[1], [0], [0], [1], [0, 0, 1, 1], [], []>} : vector<16x256xbf16>, vector<256x128xbf16>, vector<16x128xf32> -> vector<16x128xf32>
    %c0_9 = arith.constant 0 : index
    %c0_10 = arith.constant 0 : index
    %12 = vector.load %arg5[%c0_9, %c0_10] : memref<1x128xf32, #tpu.memory_space<vmem>>, vector<1x128xf32>
    %13 = vector.broadcast %12 : vector<1x128xf32> to vector<16x128xf32>
    %14 = arith.addf %11, %13 : vector<16x128xf32>
    %15 = math.tanh %14 : vector<16x128xf32>
    %16 = arith.truncf %15 : vector<16x128xf32> to vector<16x128xbf16>
    %c0_11 = arith.constant 0 : index
    %c0_12 = arith.constant 0 : index
    %17 = vector.load %arg6[%c0_11, %c0_12] : memref<128x128xbf16, #tpu.memory_space<vmem>>, vector<128x128xbf16>
    %cst_13 = arith.constant dense<0.000000e+00> : vector<16x128xf32>
    %18 = tpu.matmul %16, %17, %cst_13 {dimension_numbers = #tpu.dot_dimension_numbers<[1], [0], [0], [1], [0, 0, 1, 1], [], []>} : vector<16x128xbf16>, vector<128x128xbf16>, vector<16x128xf32> -> vector<16x128xf32>
    %c0_14 = arith.constant 0 : index
    %c0_15 = arith.constant 0 : index
    %19 = vector.load %arg7[%c0_14, %c0_15] : memref<1x128xf32, #tpu.memory_space<vmem>>, vector<1x128xf32>
    %20 = vector.broadcast %19 : vector<1x128xf32> to vector<16x128xf32>
    %21 = arith.addf %18, %20 : vector<16x128xf32>
    %c0_16 = arith.constant 0 : index
    %c0_17 = arith.constant 0 : index
    %22 = vector.load %arg8[%c0_16, %c0_17] : memref<16x128xf32, #tpu.memory_space<vmem>>, vector<16x128xf32>
    tpu.vector_store %arg8[%c0_16, %c0_17], %21 {strides = array<i32>} : memref<16x128xf32, #tpu.memory_space<vmem>>, vector<16x128xf32>,
    return
  }
  func.func @transform_0(%arg0: i32) -> (i32, i32) {
    %c0_i32 = arith.constant 0 : i32
    %c0_i32_0 = arith.constant 0 : i32
    return %arg0, %c0_i32 : i32, i32
  }
  func.func @transform_1(%arg0: i32) -> (i32, i32) {
    %c0_i32 = arith.constant 0 : i32
    %c0_i32_0 = arith.constant 0 : i32
    %c0_i32_1 = arith.constant 0 : i32
    return %c0_i32, %c0_i32_0 : i32, i32
  }
  func.func @transform_2(%arg0: i32) -> (i32, i32) {
    %c0_i32 = arith.constant 0 : i32
    %c0_i32_0 = arith.constant 0 : i32
    %c0_i32_1 = arith.constant 0 : i32
    return %c0_i32, %c0_i32_0 : i32, i32
  }
  func.func @transform_3(%arg0: i32) -> (i32, i32) {
    %c0_i32 = arith.constant 0 : i32
    %c0_i32_0 = arith.constant 0 : i32
    %c0_i32_1 = arith.constant 0 : i32
    return %c0_i32, %c0_i32_0 : i32, i32
  }
  func.func @transform_4(%arg0: i32) -> (i32, i32) {
    %c0_i32 = arith.constant 0 : i32
    %c0_i32_0 = arith.constant 0 : i32
    %c0_i32_1 = arith.constant 0 : i32
    return %c0_i32, %c0_i32_0 : i32, i32
  }
  func.func @transform_5(%arg0: i32) -> (i32, i32) {
    %c0_i32 = arith.constant 0 : i32
    %c0_i32_0 = arith.constant 0 : i32
    %c0_i32_1 = arith.constant 0 : i32
    return %c0_i32, %c0_i32_0 : i32, i32
  }
  func.func @transform_6(%arg0: i32) -> (i32, i32) {
    %c0_i32 = arith.constant 0 : i32
    %c0_i32_0 = arith.constant 0 : i32
    %c0_i32_1 = arith.constant 0 : i32
    return %c0_i32, %c0_i32_0 : i32, i32
  }
  func.func @transform_7(%arg0: i32) -> (i32, i32) {
    %c0_i32 = arith.constant 0 : i32
    %c0_i32_0 = arith.constant 0 : i32
    return %arg0, %c0_i32 : i32, i32
  }
}

</mosaic_0001>

<bundles_post_ra>
// kernel: tpu_custom_call.1
= control target key start
LH: loop header
LB: loop body
LE: loop exit
PB: predicated region body
PF: predicated region fallthrough
CT: control target
= control target key end

     0   :  { %s1758_s0 = inlined_call_operand.hbm [shape: f32[64,256], index: 0, kind: input, shape index: {}]   ;;  %s1759_s1 = inlined_call_operand.hbm [shape: bf16[256,256], index: 1, kind: input, shape index: {}]   ;;  %s1760_s2 = inlined_call_operand.vmem [shape: f32[1,256], index: 2, kind: input, shape index: {}]   ;;  %s1761_s3 = inlined_call_operand.hbm [shape: bf16[256,128], index: 3, kind: input, shape index: {}]   ;;  %s1762_s4 = inlined_call_operand.vmem [shape: f32[1,128], index: 4, kind: input, shape index: {}]   ;;  %s1763_s5 = inlined_call_operand.hbm [shape: bf16[128,128], index: 5, kind: input, shape index: {}]   ;;  %s1764_s6 = inlined_call_operand.vmem [shape: f32[1,128], index: 6, kind: input, shape index: {}]   ;;  %s1765_s7 = inlined_call_operand.hbm [shape: f32[64,128], index: 7, kind: output, shape index: {}]  }
   0x1   :  { %1770 = sst [smem:[#allocation15_spill]] %s1759_s1 }
   0x2   :  { %12 = vsyncpa [#allocation3], 0 }
   0x3   :  { %14 = vsyncpa [#allocation3 + $0x1], 0 }
   0x4   :  { %15 = vsyncpa [#allocation6], 0 }
   0x5   :  { %16 = vsyncpa [#allocation9], 0 }
   0x6   :  { %17 = vsyncpa [#allocation4], 0 }
   0x7   :  { %19 = vsyncpa [#allocation4 + $0x1], 0  ;;  %s1544_s24 = smov 0   ;;  %s1546_s25 = smov 0  }
   0x8   :  { %s1548_s26 = smov 0   ;;  %s1550_s27 = smov 0  }
   0x9 LB: > { %s1565_s28 = sadd.s32 4294967295, %s1487_s27   ;;  %s1013_s29 = sadd.s32 4294967294, %s1487_s27   ;;  %s1487_s27 = sphi %s1550_s27, %s1790_s27   ;;  %s1483_s26 = sphi %s1548_s26, %s1789_s26   ;;  %s1479_s25 = sphi %s1546_s25, %s1788_s25   ;;  %s1475_s24 = sphi %s1544_s24, %s1787_s24  }
   0xa   : > { %p45_p0 = scmp.ne.s32.totalorder %s1479_s25, %s1475_s24  ;;  %p1766_p1 = scmp.eq.s32.totalorder %s1565_s28, 0 }
   0xb   : > { %p201_p3 = scmp.eq.s32.totalorder %s1013_s29, 3  ;;  %p1014_p5 = scmp.ge.s32.totalorder %s1487_s27, 1 }
   0xc   : > { %p1574_p4 = por %p1766_p1, %p45_p0  ;;  %p208_p7 = scmp.lt.s32.totalorder %s1487_s27, 5 }
   0xd   : > { %p1579_p6 = por %p201_p3, %p45_p0  ;;  %s1489_s10 = smov [#allocation5]  }
   0xe   : > { %s1771_s30 = scalar_select %p1574_p4, 1, 0 }
   0xf   : > { %s1772_s8 = scalar_select %p1579_p6, 1, 0 }
  0x10   : > { %p1584_p8 = pnand %p1014_p5, %p208_p7  ;;  %s220_s11 = sshll.u32 %s1489_s10, 4  ;;  %s221_s11 = int_to_ptr.vmem [resolvable:$true] %s220_s11 }
  0x11   : > { %s1490_s13 = smov [#allocation7]   ;;  %s1320_s15 = scalar_lea.vmem %s221_s11, 4096 }
  0x12   : > { %s1773_s9 = scalar_select %p1584_p8, 1, 0 }
  0x13   : > { %p1162_p9 = pneg %p1584_p8  ;;  %s236_s14 = sshll.u32 %s1490_s13, 4  ;;  %s237_s14 = int_to_ptr.vmem [resolvable:$true] %s236_s14 }
  0x14   : > { %p1321_p12 = scmp.ne.s32.totalorder %s221_s11, %s1320_s15  ;;  %p1328_p3 = scmp.lt.s32.totalorder %s221_s11, %s221_s11 }
  0x15   : > { %p1592_p10 = pnand %p1162_p9, %p1766_p1  ;;  %p1329_p5 = scmp.lt.s32.totalorder %s1320_s15, %s1320_s15 }
  0x17   : > { %p1311_p11 = pneg %p1592_p10  ;;  %p1330_p7 = por %p1329_p5, %p1328_p3 }
  0x19   : > { %p1323_p13 = pnand %p1321_p12, %p1311_p11 }
  0x1b   : > { %p1324_p0 = pneg %p1323_p13 }
  0x1d   : > { %p1331_p9 = pnand %p1330_p7, %p1324_p0 }
  0x1f   : > { %1334 = shalt.err (!%p1331_p9)
}
  0x20   : > { %s1491_s16 = smov 128   ;;  %s1492_s17 = smov 8  }
  0x21   : > { %s1775_s1 = sld [smem:[#allocation15_spill]]  ;;  %s1346_s20 = scalar_lea.vmem %s237_s14, 2048 }
  0x22   : > { %p1347_p1 = scmp.ne.s32.totalorder %s237_s14, %s1346_s20  ;;  %p1354_p2 = scmp.lt.s32.totalorder %s237_s14, %s237_s14 }
  0x23   : > { %p1355_p6 = scmp.lt.s32.totalorder %s1346_s20, %s1346_s20 }
  0x24   : > { %p1349_p12 = pnand %p1347_p1, %p1311_p11 }
  0x25   : > { %p1356_p3 = por %p1355_p6, %p1354_p2 }
  0x26   : > { %p1350_p13 = pneg %p1349_p12 }
  0x27   : > { %1165 = dma.hbm_to_vmem [thread:$0]  (!%p1592_p10), %s1775_s1, 4096, %s221_s11, [#allocation6], %s1491_s16, %s1491_s16, %s1492_s17  }
  0x28   : > { %p1357_p0 = pnand %p1356_p3, %p1350_p13 }
  0x2a   : > { %1360 = shalt.err (!%p1357_p0)
}
  0x2b   : > { %s1493_s21 = smov 64   ;;  %s1494_s22 = smov 4  }
  0x2c   : > { %1168 = dma.hbm_to_vmem [thread:$0]  (!%p1592_p10), %s1761_s3, 2048, %s237_s14, [#allocation6], %s1493_s21, %s1493_s21, %s1494_s22  }
  0x2d   : > { %s1495_s10 = smov [#allocation8]   ;;  %s1615_s13 = sadd.s32 1, %s1487_s27  }
  0x2e   : > { %s252_s11 = sshll.u32 %s1495_s10, 4  ;;  %s253_s11 = int_to_ptr.vmem [resolvable:$true] %s252_s11 }
  0x2f   : > { %s1372_s15 = scalar_lea.vmem %s253_s11, 1024  ;;  %p1380_p5 = scmp.lt.s32.totalorder %s253_s11, %s253_s11 }
  0x30   : > { %p1373_p1 = scmp.ne.s32.totalorder %s253_s11, %s1372_s15  ;;  %p1381_p7 = scmp.lt.s32.totalorder %s1372_s15, %s1372_s15 }
  0x32   : > { %p1375_p2 = pnand %p1373_p1, %p1311_p11  ;;  %p1382_p9 = por %p1381_p7, %p1380_p5 }
  0x34   : > { %p1376_p6 = pneg %p1375_p2 }
  0x36   : > { %p1383_p12 = pnand %p1382_p9, %p1376_p6 }
  0x38   : > { %1386 = shalt.err (!%p1383_p12)
}
  0x39   : > { %1171 = dma.hbm_to_vmem [thread:$0]  (!%p1592_p10), %s1763_s5, 1024, %s253_s11, [#allocation9], %s1493_s21, %s1493_s21, %s1494_s22  }
  0x3a   : > { %s29_s17 = ssub.s32 %s1487_s27, %s1615_s13  ;;  %s32_s18 = sadd.s32 1, %s1483_s26 }
  0x3b   : > { %p30_p11 = scmp.eq.s32.totalorder %s29_s17, 0  ;;  %p39_p13 = scmp.ne.s32.totalorder %s1483_s26, %s1479_s25 }
  0x3c   : > { %p40_p3 = scmp.eq.s32.totalorder %s1487_s27, 0  ;;  %p1183_p0 = scmp.lt.s32.totalorder %s1487_s27, 4 }
  0x3d   : > { %s1633_s12 = scalar_select %p30_p11, %s1483_s26, %s32_s18  }
  0x3e   : > { %p41_p1 = por %p40_p3, %p39_p13  ;;  %p1776_p2 = scmp.eq.s32.totalorder %s1565_s28, 3 }
  0x3f   : > { %s269_s20 = sand.u32 1, %s1483_s26   ;;  %s1093_s23 = sshll.u32 %s1487_s27, 9 }
  0x40   : > { %p1637_p6 = por %p1776_p2, %p39_p13  ;;  %s1019_s29 = sshll.u32 %s269_s20, 5 }
  0x41   : > { %s1646_s21 = scalar_lea.hbm %s1758_s0, %s1093_s23  ;;  %s273_s22 = scalar_lea.vmem [#allocation2], %s1019_s29 }
  0x42   : > { %s1777_s19 = scalar_select %p1637_p6, 1, 0 }
  0x43   : > { %s281_s11 = sshll.u32 %s273_s22, 4  ;;  %p1648_p10 = pnand %p1183_p0, %p41_p1  ;;  %s1652_s11 = int_to_ptr.vmem [resolvable:$true] %s281_s11 }
  0x44   : > { %s1654_s14 = scalar_lea.sflag [#allocation3], %s269_s20  ;;  %s1387_s17 = scalar_lea.hbm %s1646_s21, 512 }
  0x45   : > { %p1388_p5 = scmp.ne.s32.totalorder %s1646_s21, %s1387_s17  ;;  %p1389_p7 = pneg %p1648_p10 }
  0x46   : > { %s1392_s29 = scalar_lea.hbm %s1758_s0, 2048  ;;  %p1393_p11 = scmp.lt.s32.totalorder %s1646_s21, %s1758_s0 }
  0x47   : > { %p1390_p9 = pnand %p1389_p7, %p1388_p5  ;;  %p1394_p13 = scmp.lt.s32.totalorder %s1392_s29, %s1387_s17 }
  0x49   : > { %p1391_p12 = pneg %p1390_p9  ;;  %p1395_p3 = por %p1394_p13, %p1393_p11 }
  0x4b   : > { %p1396_p0 = pnand %p1395_p3, %p1391_p12 }
  0x4d   : > { %1399 = shalt.err (!%p1396_p0)
}
  0x4e   : > { %s1400_s20 = scalar_lea.vmem %s1652_s11, 512  ;;  %s1496_s22 = smov [#allocation2]  }
  0x4f   : > { %p1401_p1 = scmp.ne.s32.totalorder %s1652_s11, %s1400_s20  ;;  %s1405_s1 = sshll.u32 %s1496_s22, 4  ;;  %s1406_s1 = int_to_ptr.vmem [resolvable:$false] %s1405_s1 }
  0x50   : > { %s1407_s18 = scalar_lea.vmem %s1406_s1, 1024  ;;  %p1408_p9 = scmp.lt.s32.totalorder %s1652_s11, %s1406_s1 }
  0x51   : > { %p1403_p2 = pnand %p1401_p1, %p1389_p7  ;;  %p1409_p6 = scmp.lt.s32.totalorder %s1407_s18, %s1400_s20 }
  0x53   : > { %p1404_p5 = pneg %p1403_p2  ;;  %p1410_p4 = por %p1409_p6, %p1408_p9 }
  0x55   : > { %p1411_p8 = pnand %p1410_p4, %p1404_p5 }
  0x57   : > { %1414 = shalt.err (!%p1411_p8)
}
  0x58   : > { %s1497_s17 = smov 256   ;;  %s1498_s23 = smov 16  }
  0x59   : > { %1175 = dma.hbm_to_vmem [thread:$0]  (!%p1648_p10), %s1646_s21, 512, %s1652_s11, %s1654_s14, %s1497_s17, %s1497_s17, %s1498_s23  }
  0x5a   : > { %p1779_p7 = scmp.ne.s32.totalorder %s1773_s9, 0 }
  0x5b   : > { %s1678_s29 = sand.u32 (!%p1779_p7), 1, %s1479_s25   ;;  %p1780_p4 = scmp.ne.s32.totalorder (!%p1779_p7), %s1771_s30, 0 }
  0x5c   : > { %293 = sbr.rel (%p1779_p7) target bundleno = 808 (0x328), region = 48  ;;  %s1024_s1 = sshll.u32 (!%p1779_p7), %s1678_s29, 5 }
  0x5d   : > { %s296_s10 = scalar_lea.sflag (!%p1779_p7), [#allocation3], %s1678_s29  ;;  %s1682_s15 = scalar_lea.vmem (!%p1779_p7), [#allocation2], %s1024_s1 }
  0x61   : > { %1458 = dma.done.wait (%p1780_p4), %s296_s10, 512  }
  0x62   : > { %1460 = vsyncadd (%p1780_p4), %s296_s10, 4294966784  ;;  %p1781_p8 = scmp.eq.s32.totalorder %s1565_s28, 0 }
  0x64   : > { %1462 = dma.done.wait (%p1781_p8), [#allocation6], 6144   ;;  %p1782_p6 = pmov %p1781_p8 }
  0x66   : > { %1464 = vsyncadd (%p1782_p6), [#allocation6], 4294961152  ;;  %p1783_p10 = pmov %p1782_p6 }
  0x67   : > { %p1784_p12 = pmov %p1782_p6 }
  0x68   : > { %1466 = dma.done.wait (%p1783_p10), [#allocation9], 1024  }
  0x69   : > { %1468 = vsyncadd (%p1784_p12), [#allocation9], 4294966272  ;;  %v1233_v0 = vld [vmem:[#allocation5 + $0x74] ss:$8 sps:$4 sm:$0xff]   ;;  %v1235_v1 = vld [vmem:[#allocation5 + $0x70] ss:$8 sps:$4 sm:$0xff]   ;;  %v385_v55 = vlaneseq }
  0x6a   : > { %555 = vmatprep.subr.bf16.mxu0 %v1233_v0  ;;  %v1236_v2 = vld [vmem:[#allocation5 + $0x64] ss:$8 sps:$4 sm:$0xff]   ;;  %v1238_v3 = vld [vmem:[#allocation5 + $0x60] ss:$8 sps:$4 sm:$0xff]   ;;  %v1239_v4 = vld [vmem:[#allocation5 + $0x54] ss:$8 sps:$4 sm:$0xff]  }
  0x6b   : > { %556 = vmatpush1.bf16.msra.mxu0 %v1235_v1  ;;  %v1241_v5 = vld [vmem:[#allocation5 + $0x50] ss:$8 sps:$4 sm:$0xff]   ;;  %v1242_v6 = vld [vmem:[#allocation5 + $0x44] ss:$8 sps:$4 sm:$0xff]   ;;  %v1244_v7 = vld [vmem:[#allocation5 + $0x40] ss:$8 sps:$4 sm:$0xff]  }
  0x6c   : > { %557 = vmatprep.subr.bf16.mxu0 %v1236_v2  ;;  %v1245_v8 = vld [vmem:[#allocation5 + $0x34] ss:$8 sps:$4 sm:$0xff]   ;;  %v1247_v9 = vld [vmem:[#allocation5 + $0x30] ss:$8 sps:$4 sm:$0xff]   ;;  %v1248_v10 = vld [vmem:[#allocation5 + $0x24] ss:$8 sps:$4 sm:$0xff]  }
  0x6d   : > { %v1250_v11 = vld [vmem:[#allocation5 + $0x20] ss:$8 sps:$4 sm:$0xff]   ;;  %v1251_v12 = vld [vmem:[#allocation5 + $0x14] ss:$8 sps:$4 sm:$0xff]   ;;  %v1253_v15 = vld [vmem:[#allocation5 + $0x10] ss:$8 sps:$4 sm:$0xff]  }
  0x6e   : > { %v346_v13 = vld [vmem:[%s1682_s15 + $0x8] sm:$0xff]  ;;  %v348_v14 = vld [vmem:[%s1682_s15 + $0x18] sm:$0xff]  ;;  %v1283_v21 = vld [vmem:[#allocation7 + $0x70] sm:$0xff]   ;;  %v1499_v54 = vmov 0.0   ;;  %v386_v56 = vshrl.u32 %v385_v55, 7  ;;  %vm1500_vm0 = vmmov 0  }
  0x6f   : > { %558 = vmatpush1.bf16.msra.mxu0 %v1238_v3  ;;  %v1254_v16 = vld [vmem:[#allocation5 + $0x4] ss:$8 sps:$4 sm:$0xff]   ;;  %v350_v17 = vpack.c.bf16 %v348_v14, %v346_v13  ;;  %v1281_v18 = vld [vmem:[#allocation7 + $0x78] sm:$0xff]   ;;  %v1256_v20 = vld [vmem:[#allocation5] ss:$8 sps:$4 sm:$0xff]   ;;  %s1028_s16 = sshll.u32 %s1678_s29, 4 }
  0x70   : > { %559 = vmatprep.subr.bf16.mxu0 %v1239_v4  ;;  %v1282_v19 = vld [vmem:[#allocation7 + $0x38] sm:$0xff]   ;;  %1095 = vmatprep.subr.bf16.mxu1 %v1281_v18  ;;  %v1284_v22 = vld [vmem:[#allocation7 + $0x30] sm:$0xff]   ;;  %v1285_v23 = vld [vmem:[#allocation7 + $0x68] sm:$0xff]   ;;  %v391_v57 = vsub.s32 1, %v386_v56  ;;  %v387_v58 = vsub.s32 0, %v386_v56  ;;  %s341_s22 = scalar_lea.vmem [#allocation10], %s1028_s16 }
  0x71   : > { %587 = vmatprep.mubr.bf16.mxu0 %v350_v17  ;;  %1096 = vmatpush3.bf16.msra.mxu1 %v1282_v19  ;;  %v1257_v24 = vld [vmem:[#allocation5 + $0xf4] ss:$8 sps:$4 sm:$0xff]   ;;  %v1259_v25 = vld [vmem:[#allocation5 + $0xf0] ss:$8 sps:$4 sm:$0xff]   ;;  %v1286_v26 = vld [vmem:[#allocation7 + $0x28] sm:$0xff]   ;;  %s911_s18 = sshll.u32 %s341_s22, 4  ;;  %s1711_s18 = int_to_ptr.vmem [resolvable:$true] %s911_s18 }
  0x72   : > { %1097 = vmatprep.subr.bf16.mxu1 %v1283_v21  ;;  %v1287_v27 = vld [vmem:[#allocation7 + $0x60] sm:$0xff]   ;;  %v1289_v31 = vld [vmem:[#allocation7 + $0x58] sm:$0xff]   ;;  %v347_v46 = vld [vmem:[%s1682_s15 + $0x10] sm:$0xff]  ;;  %s1094_s17 = sshll.u32 %s1565_s28, 8  ;;  %s1415_s30 = scalar_lea.vmem %s1711_s18, 256 }
  0x73   : > { %560 = vmatpush1.bf16.msra.mxu0 %v1241_v5  ;;  %v1260_v28 = vld [vmem:[#allocation5 + $0xe4] ss:$8 sps:$4 sm:$0xff]   ;;  %v1262_v30 = vld [vmem:[#allocation5 + $0xe0] ss:$8 sps:$4 sm:$0xff]   ;;  %v1263_v32 = vld [vmem:[#allocation5 + $0xd4] ss:$8 sps:$4 sm:$0xff]   ;;  %s1716_s10 = scalar_lea.hbm %s1765_s7, %s1094_s17  ;;  %p1416_p11 = scmp.ne.s32.totalorder %s1711_s18, %s1415_s30 }
  0x74   : > { %561 = vmatprep.subr.bf16.mxu0 %v1242_v6  ;;  %v1288_v29 = vld [vmem:[#allocation7 + $0x20] sm:$0xff]   ;;  %v1290_v33 = vld [vmem:[#allocation7 + $0x18] sm:$0xff]   ;;  %v1291_v48 = vld [vmem:[#allocation7 + $0x50] sm:$0xff]   ;;  %p1785_p13 = scmp.ne.s32.totalorder %s1777_s19, 0  ;;  %s1501_s28 = smov [#allocation10]  }
  0x75   : > { %1098 = vmatpush3.bf16.msra.mxu1 %v1284_v22  ;;  %v1265_v34 = vld [vmem:[#allocation5 + $0xd0] ss:$8 sps:$4 sm:$0xff]   ;;  %v1266_v35 = vld [vmem:[#allocation5 + $0xc4] ss:$8 sps:$4 sm:$0xff]   ;;  %v1268_v36 = vld [vmem:[#allocation5 + $0xc0] ss:$8 sps:$4 sm:$0xff]  }
  0x76   : > { %1099 = vmatprep.subr.bf16.mxu1 %v1285_v23  ;;  %v1269_v37 = vld [vmem:[#allocation5 + $0xb4] ss:$8 sps:$4 sm:$0xff]   ;;  %v1271_v38 = vld [vmem:[#allocation5 + $0xb0] ss:$8 sps:$4 sm:$0xff]   ;;  %v1272_v39 = vld [vmem:[#allocation5 + $0xa4] ss:$8 sps:$4 sm:$0xff]   ;;  %p1417_p3 = pnand %p1416_p11, %p1785_p13 }
  0x77   : > { %562 = vmatpush1.bf16.msra.mxu0 %v1244_v7  ;;  %v1274_v40 = vld [vmem:[#allocation5 + $0xa0] ss:$8 sps:$4 sm:$0xff]   ;;  %v1275_v41 = vld [vmem:[#allocation5 + $0x94] ss:$8 sps:$4 sm:$0xff]   ;;  %v1277_v42 = vld [vmem:[#allocation5 + $0x90] ss:$8 sps:$4 sm:$0xff]  }
  0x78   : > { %563 = vmatprep.subr.bf16.mxu0 %v1245_v8  ;;  %v1278_v43 = vld [vmem:[#allocation5 + $0x84] ss:$8 sps:$4 sm:$0xff]   ;;  %v1280_v44 = vld [vmem:[#allocation5 + $0x80] ss:$8 sps:$4 sm:$0xff]   ;;  %v1292_v49 = vld [vmem:[#allocation7 + $0x10] sm:$0xff]   ;;  %p1418_p0 = pneg %p1417_p3  ;;  %s1419_s9 = sshll.u32 %s1501_s28, 4  ;;  %s1420_s9 = int_to_ptr.vmem [resolvable:$false] %s1419_s9 }
  0x79   : > { %1100 = vmatpush3.bf16.msra.mxu1 %v1286_v26  ;;  %v345_v45 = vld [vmem:[%s1682_s15] sm:$0xff]  ;;  %v1293_v50 = vld [vmem:[#allocation7 + $0x48] sm:$0xff]   ;;  %v1298_v13 = vld [vmem:[#allocation8 + $0x30] sm:$0xff]   ;;  %s898_s15 = scalar_lea.sflag [#allocation4], %s1678_s29  ;;  %s1421_s21 = scalar_lea.vmem %s1420_s9, 512 }
  0x7a   : > { %1101 = vmatprep.subr.bf16.mxu1 %v1287_v27  ;;  %v349_v47 = vpack.c.bf16 %v347_v46, %v345_v45  ;;  %v1294_v51 = vld [vmem:[#allocation7 + $0x8] sm:$0xff]   ;;  %v1295_v52 = vld [vmem:[#allocation7 + $0x40] sm:$0xff]   ;;  %v1302_v17 = vld [vmem:[#allocation8 + $0x10] sm:$0xff]   ;;  %p1422_p1 = scmp.lt.s32.totalorder %s1711_s18, %s1420_s9  ;;  %p1423_p2 = scmp.lt.s32.totalorder %s1421_s21, %s1415_s30 }
  0x7b   : > { %564 = vmatpush1.bf16.msra.mxu0 %v1247_v9  ;;  %v1296_v53 = vld [vmem:[#allocation7] sm:$0xff]   ;;  %v1299_v14 = vld [vmem:[#allocation8 + $0x28] sm:$0xff]  }
  0x7c   : > { %565 = vmatprep.subr.bf16.mxu0 %v1248_v10  ;;  %v383_v59 = vld [vmem:[%s1760_s2] sm:$0x3]  ;;  %v1303_v18 = vld [vmem:[#allocation8 + $0x8] sm:$0xff]   ;;  %p1424_p5 = por %p1423_p2, %p1422_p1 }
  0x7d   : > { %1102 = vmatpush3.bf16.msra.mxu1 %v1288_v29  ;;  %v392_v61 = vrot.slane %v383_v59, %v391_v57  ;;  %v388_v62 = vrot.slane %v383_v59, %v387_v58  ;;  %v1304_v19 = vld [vmem:[#allocation8] sm:$0xff]  }
  0x7e   : > { %1103 = vmatprep.subr.bf16.mxu1 %v1289_v31  ;;  %v1061_v22 = vld [vmem:[%s1762_s4] ss:$0 sm:$0xff]  ;;  %p1425_p9 = pnand %p1424_p5, %p1418_p0 }
  0x7f   : > { %566 = vmatpush1.bf16.msra.mxu0 %v1250_v11  ;;  %v1297_v11 = vld [vmem:[#allocation8 + $0x38] sm:$0xff]  }
  0x80   : > { %567 = vmatprep.subr.bf16.mxu0 %v1251_v12 }
  0x81   : > { %1104 = vmatpush3.bf16.msra.mxu1 %v1290_v33 }
  0x82   : > { %1105 = vmatprep.subr.bf16.mxu1 %v1291_v48 }
  0x83   : > { %568 = vmatpush1.bf16.msra.mxu0 %v1253_v15  ;;  %v1300_v15 = vld [vmem:[#allocation8 + $0x20] sm:$0xff]  }
  0x84   : > { %569 = vmatprep.subr.bf16.mxu0 %v1254_v16  ;;  %v1301_v16 = vld [vmem:[#allocation8 + $0x18] sm:$0xff]  }
  0x85   : > { %1106 = vmatpush3.bf16.msra.mxu1 %v1292_v49 }
  0x86   : > { %1107 = vmatprep.subr.bf16.mxu1 %v1293_v50 }
  0x87   : > { %570 = vmatpush1.bf16.msra.mxu0 %v1256_v20 }
  0x88   : > { %571 = vmatprep.subr.bf16.mxu0 %v1257_v24 }
  0x89   : > { %1108 = vmatpush3.bf16.msra.mxu1 %v1294_v51 }
  0x8a   : > { %1109 = vmatprep.subr.bf16.mxu1 %v1295_v52 }
  0x8b   : > { %572 = vmatpush2.bf16.msra.mxu0 %v1259_v25 }
  0x8c   : > { %573 = vmatprep.subr.bf16.mxu0 %v1260_v28 }
  0x8d   : > { %1110 = vmatpush3.bf16.msra.mxu1 %v1296_v53 }
  0x8e   : > { %1126 = vmatprep.subr.bf16.mxu1 %v1499_v54 }
  0x8f   : > { %574 = vmatpush2.bf16.msra.mxu0 %v1262_v30 }
  0x90   : > { %575 = vmatprep.subr.bf16.mxu0 %v1263_v32  ;;  %v1078_v32 = vld [vmem:[%s1764_s6] ss:$0 sm:$0xff] }
  0x93   : > { %576 = vmatpush2.bf16.msra.mxu0 %v1265_v34 }
  0x94   : > { %577 = vmatprep.subr.bf16.mxu0 %v1266_v35 }
  0x97   : > { %578 = vmatpush2.bf16.msra.mxu0 %v1268_v36 }
  0x98   : > { %579 = vmatprep.subr.bf16.mxu0 %v1269_v37 }
  0x9b   : > { %580 = vmatpush2.bf16.msra.mxu0 %v1271_v38 }
  0x9c   : > { %581 = vmatprep.subr.bf16.mxu0 %v1272_v39 }
  0x9f   : > { %582 = vmatpush2.bf16.msra.mxu0 %v1274_v40 }
  0xa0   : > { %583 = vmatprep.subr.bf16.mxu0 %v1275_v41 }
  0xa3   : > { %584 = vmatpush2.bf16.msra.mxu0 %v1277_v42 }
  0xa4   : > { %585 = vmatprep.subr.bf16.mxu0 %v1278_v43 }
  0xa7   : > { %586 = vmatpush2.bf16.msra.mxu0 %v1280_v44 }
  0xaa   : > { %588 = vmatmul.mubr.bf16.vlgmr.msra.gmra.mxu0 %v349_v47 }
 0x16a   : > { %v589_v60 = vpop.f32.mrf.mxu0 }
 0x16b   : > { %v590_v3 = vadd.f32 %v589_v60, %v388_v62 }
 0x16c   : > { %v591_v63 = vpop.f32.mrf.mxu0 }
 0x16d   : > { %v592_v1 = vadd.f32 %v591_v63, %v392_v61  ;;  %v598_v9 = vmax.f32 %v590_v3, 0.0 }
 0x16e   : > { %v593_v0 = vpop.f32.mrf.mxu0 }
 0x16f   : > { %v594_v2 = vadd.f32 %v593_v0, %v388_v62  ;;  %v599_v7 = vmax.f32 %v592_v1, 0.0 }
 0x170   : > { %v595_v4 = vpop.f32.mrf.mxu0 }
 0x171   : > { %v596_v5 = vadd.f32 %v595_v4, %v392_v61  ;;  %v600_v6 = vmax.f32 %v594_v2, 0.0 }
 0x173   : > { %v601_v8 = vmax.f32 %v596_v5, 0.0  ;;  %v602_v12 = vpack.c.bf16 %v600_v6, %v598_v9 }
 0x175   : > { %v603_v10 = vpack.c.bf16 %v601_v8, %v599_v7 }
 0x177   : > { %771 = vmatprep.mubr.bf16.mxu1 %v603_v10 }
 0x178   : > { %772 = vmatmul.mubr.bf16.vlgmr.msra.gmra.mxu1 %v602_v12 }
 0x179   : > { %1127 = vmatpush3.bf16.msra.mxu1 %v1297_v11  ;;  %1142 = vmatprep.mubr.msk.bf16.mxu1 %vm1500_vm0, %v1499_v54 }
 0x17a   : > { %1128 = vmatprep.subr.bf16.mxu1 %v1499_v54 }
 0x17d   : > { %1129 = vmatpush3.bf16.msra.mxu1 %v1298_v13 }
 0x17e   : > { %1130 = vmatprep.subr.bf16.mxu1 %v1499_v54 }
 0x181   : > { %1131 = vmatpush3.bf16.msra.mxu1 %v1299_v14 }
 0x182   : > { %1132 = vmatprep.subr.bf16.mxu1 %v1499_v54 }
 0x185   : > { %1133 = vmatpush3.bf16.msra.mxu1 %v1300_v15 }
 0x186   : > { %1134 = vmatprep.subr.bf16.mxu1 %v1499_v54 }
 0x189   : > { %1135 = vmatpush3.bf16.msra.mxu1 %v1301_v16 }
 0x18a   : > { %1136 = vmatprep.subr.bf16.mxu1 %v1499_v54 }
 0x18d   : > { %1137 = vmatpush3.bf16.msra.mxu1 %v1302_v17 }
 0x18e   : > { %1138 = vmatprep.subr.bf16.mxu1 %v1499_v54 }
 0x191   : > { %1139 = vmatpush3.bf16.msra.mxu1 %v1303_v18 }
 0x192   : > { %1140 = vmatprep.subr.bf16.mxu1 %v1499_v54 }
 0x195   : > { %1141 = vmatpush3.bf16.msra.mxu1 %v1304_v19 }
 0x238   : > { %v1111_v20 = vpop.f32.mrf.mxu1 }
 0x23a   : > { %v1112_v21 = vpop.f32.mrf.mxu1 }
 0x23b   : > { %v1113_v23 = vadd.f32 %v1112_v21, %v1111_v20 }
 0x23c   : > { %v1114_v24 = vpop.f32.mrf.mxu1 }
 0x23d   : > { %v774_v25 = vadd.f32 %v1113_v23, %v1061_v22 }
 0x23e   : > { %v1115_v26 = vpop.f32.mrf.mxu1 }
 0x23f   : > { %v1116_v27 = vadd.f32 %v1115_v26, %v1114_v24  ;;  %1305 = vtanh.f32 %v774_v25 }
 0x241   : > { %v777_v28 = vadd.f32 %v1116_v27, %v1061_v22 }
 0x243   : > { %1307 = vtanh.f32 %v777_v28 }
 0x24c   : > { %v1306_v29 = vpop.eup %1305 }
 0x250   : > { %v1308_v30 = vpop.eup %1307 }
 0x251   : > { %v782_v31 = vpack.c.bf16 %v1308_v30, %v1306_v29 }
 0x253   : > { %1143 = vmatmul.mubr.bf16.vlgmr.msra.gmra.mxu1 %v782_v31 }
 0x313   : > { %v888_v33 = vpop.f32.mrf.mxu1 }
 0x314   : > { %v889_v34 = vadd.f32 %v1078_v32, %v888_v33 }
 0x315   : > { %v1144_v35 = vpop.f32.mrf.mxu1 }
 0x316   : > { %895 = vst [vmem:[%s341_s22] sm:$0xff] %v889_v34 }
 0x317   : > { %v891_v36 = vpop.f32.mrf.mxu1 }
 0x318   : > { %v892_v37 = vadd.f32 %v1078_v32, %v891_v36 }
 0x319   : > { %v1145_v38 = vpop.f32.mrf.mxu1 }
 0x31a   : > { %896 = vst [vmem:[%s341_s22 + $0x8] sm:$0xff] %v892_v37 }
 0x31b   : > { %1428 = shalt.err (!%p1425_p9)
}
 0x31c   : > { %s1429_s11 = scalar_lea.hbm %s1716_s10, 256  ;;  %s1433_s20 = scalar_lea.hbm %s1765_s7, 1024 }
 0x31d   : > { %p1430_p7 = scmp.ne.s32.totalorder %s1716_s10, %s1429_s11  ;;  %p1434_p6 = scmp.lt.s32.totalorder %s1716_s10, %s1765_s7 }
 0x31e   : > { %p1435_p10 = scmp.lt.s32.totalorder %s1433_s20, %s1429_s11 }
 0x31f   : > { %p1431_p4 = pnand %p1430_p7, %p1785_p13 }
 0x320   : > { %p1436_p12 = por %p1435_p10, %p1434_p6 }
 0x321   : > { %p1432_p8 = pneg %p1431_p4 }
 0x323   : > { %p1437_p11 = pnand %p1436_p12, %p1432_p8 }
 0x325   : > { %1440 = shalt.err (!%p1437_p11)
}
 0x326   : > { %s1502_s23 = smov 128   ;;  %s1503_s1 = smov 8  }
 0x327   : > { %1160 = dma.vmem_to_hbm [thread:$0]  (%p1785_p13), %s1711_s18, 256, %s1716_s10, %s898_s15, %s1502_s23, %s1502_s23, %s1503_s1  }
 0x328 PF: > { %p1187_p3 = scmp.ge.s32.totalorder %s1487_s27, 2  ;;  %s926_s30 = sand.u32 1, %s1475_s24  }
 0x329   : > { %p1786_p0 = scmp.ne.s32.totalorder %s1772_s8, 0  ;;  %s927_s28 = scalar_lea.sflag [#allocation4], %s926_s30 }
 0x32b   : > { %p1177_p1 = pnand %p1187_p3, %p1786_p0 }
 0x32d   : > { %p1178_p2 = pneg %p1177_p1 }
 0x32f   : > { %1470 = dma.done.wait (%p1178_p2), %s927_s28, 256  }
 0x330   : > { %1472 = vsyncadd (%p1178_p2), %s927_s28, 4294967040  ;;  %p22_p5 = scmp.ge.s32.totalorder %s1615_s13, 6   ;;  %s1787_s24 = smov %s1479_s25 }
 0x331   : > { %s1788_s25 = smov %s1483_s26  ;;  %s1789_s26 = smov %s1633_s12 }
 0x332   : > { %s1790_s27 = smov %s1615_s13  ;;  %24 = sbr.rel (!%p22_p5) target bundleno = 9 (0x9), region = 105 }
 0x337   :  { %932 = vsyncpa [#allocation3], 1 }
 0x338   :  { %934 = vsyncpa [#allocation3 + $0x1], 1 }
 0x339   :  { %935 = vsyncpa [#allocation6], 1 }
 0x33a   :  { %936 = vsyncpa [#allocation9], 1 }
 0x33b   :  { %937 = vsyncpa [#allocation4], 1 }
 0x33c   :  { %939 = vsyncpa [#allocation4 + $0x1], 1 }

</bundles_post_ra>
